<compile_context>
chip_gen: v5e
topology: v5e:2x2
jax: 0.10.0
libtpu: 0.0.40
codegen_flags: <defaults>
</compile_context>

<pallas_src>
import jax
import jax.numpy as jnp
from jax.experimental import pallas as pl
from jax.experimental.pallas import tpu as pltpu


# ----------------------------- Pallas kernel ------------------------------
def _node_embed_kernel(xt_ref, wt_ref, bt_ref, ot_ref):
    # Channels-first / lane-dense layout:
    #   xt_ref: (d_in,  TN)   node features, nodes on the lane axis
    #   wt_ref: (d_out, d_in) folded weight (input normalization pre-applied)
    #   bt_ref: (d_out, 1)    folded bias
    #   ot_ref: (d_out, TN)
    x = xt_ref[...]
    w = wt_ref[...]
    d_in = x.shape[0]
    # d_in is tiny (3): unrolled VPU outer-product multiply-adds, no MXU.
    acc = w[:, 0:1] * x[0:1, :]
    for k in range(1, d_in):
        acc = acc + w[:, k:k + 1] * x[k:k + 1, :]
    ot_ref[...] = (acc + bt_ref[...]).astype(ot_ref.dtype)


# ------------------------------- wrapper -----------------------------------
def node_embedding_forward(x, weight, bias, input_mean, input_std, *,
                           tile_n=8192, out_dtype=None):
    """NodeEmbeddingNetwork.forward: ((x - mean) / std) @ W + b.

    x: (N, d_in) float -> (N, d_out).  Normalization is folded into (W, b)
    exactly; the kernel runs channels-first so all loads/stores are lane-dense.
    """
    n, d_in = x.shape
    d_out = weight.shape[1]
    out_dtype = x.dtype if out_dtype is None else out_dtype

    # Exact algebraic fold of the input normalization into the linear layer.
    w32 = weight.astype(jnp.float32)
    inv_std = (1.0 / input_std.astype(jnp.float32)).reshape(d_in)
    mean = input_mean.astype(jnp.float32).reshape(d_in)
    w_fold = w32 * inv_std[:, None]                              # (d_in, d_out)
    b_fold = bias.astype(jnp.float32).reshape(d_out) - (mean * inv_std) @ w32

    # Lane-dense, channels-first operands.  Lane (last) axis of every block
    # must be a multiple of 128, sublane axes are full dims (3 / 56) -> legal.
    tn = min(tile_n, pl.cdiv(n, 128) * 128)
    tn = max(128, (tn // 128) * 128)
    n_pad = pl.cdiv(n, tn) * tn

    xt = jnp.zeros((d_in, n_pad), jnp.float32).at[:, :n].set(
        x.astype(jnp.float32).T)
    wt = w_fold.T                                                # (d_out, d_in)
    bt = b_fold.reshape(d_out, 1)

    grid = (n_pad // tn,)
    out_t = pl.pallas_call(
        _node_embed_kernel,
        out_shape=jax.ShapeDtypeStruct((d_out, n_pad), out_dtype),
        grid_spec=pltpu.PrefetchScalarGridSpec(
            num_scalar_prefetch=0,
            grid=grid,
            in_specs=[
                pl.BlockSpec((d_in, tn), lambda i: (0, i)),     # x tile (lane-dense)
                pl.BlockSpec((d_out, d_in), lambda i: (0, 0)),  # folded weight (tiny, resident)
                pl.BlockSpec((d_out, 1), lambda i: (0, 0)),     # folded bias
            ],
            out_specs=pl.BlockSpec((d_out, tn), lambda i: (0, i)),
        ),
        compiler_params=pltpu.CompilerParams(
            dimension_semantics=("parallel",),   # megacore-shardable on v7x
        ),
    )(xt, wt, bt)

    # Back to the module's node-major layout.  This transpose is API plumbing;
    # a channels-first consumer should use out_t[:, :n] directly.
    return out_t[:, :n].T


# --------------------- deterministic parameter setup ----------------------
def make_params():
    """LinearRS parameters for irreps '3x0e' -> '32x0e + 8x1e'."""
    mul_in_0e = 3           # 3x0e input (e.g. RGB)
    mul_out_0e = 32         # 32x0e output scalars
    mul_out_1e = 8          # 8x1e output vectors -> 24 dims, no 0e->1e path
    d_in = mul_in_0e
    d_out = mul_out_0e + 3 * mul_out_1e  # 56

    key = jax.random.PRNGKey(0)
    k_w, k_b = jax.random.split(key)

    # e3nn-style weights N(0,1), path-normalized by 1/sqrt(fan_in) for 0e->0e.
    w_0e = jax.random.normal(k_w, (mul_in_0e, mul_out_0e), dtype=jnp.float32)
    w_0e = w_0e / jnp.sqrt(jnp.float32(mul_in_0e))

    weight = jnp.zeros((d_in, d_out), dtype=jnp.float32)
    weight = weight.at[:, :mul_out_0e].set(w_0e)   # l=1 columns stay zero

    # bias only on scalar (0e) outputs
    b_0e = jax.random.normal(k_b, (mul_out_0e,), dtype=jnp.float32) * 0.1
    bias = jnp.zeros((d_out,), dtype=jnp.float32).at[:mul_out_0e].set(b_0e)

    input_mean = jnp.array([0.5, 0.5, 0.5], dtype=jnp.float32)
    input_std = jnp.array([0.5, 0.5, 0.5], dtype=jnp.float32)
    return input_mean, input_std, weight, bias, d_out


# --------------------------------- main ------------------------------------
if __name__ == "__main__":
    input_mean, input_std, weight, bias, d_out = make_params()

    # NOTE: for toy sizes like N=64 plain XLA would win; the kernel is built
    # for production-scale N (it tiles 8192 nodes per grid step).
    N, D_IN = 64, 3
    x = jax.random.uniform(jax.random.PRNGKey(0), (N, D_IN), dtype=jnp.float32)

    out = node_embedding_forward(x, weight, bias, input_mean, input_std)
    out = jax.block_until_ready(out)

    # pure-JAX reference (original, un-folded formulation)
    x_norm = (x - input_mean[None, :]) / input_std[None, :]
    ref = x_norm @ weight + bias[None, :]
    assert out.shape == (N, d_out)
    assert jnp.allclose(out, ref, atol=1e-5, rtol=1e-5)

    print("KERNEL_OK")
</pallas_src>

<mosaic_0001>
module attributes {stable_mosaic.version = 11 : i64} {
  func.func @_node_embed_kernel(%arg0: i32, %arg1: memref<3x128xf32, #tpu.memory_space<vmem>>, %arg2: memref<56x3xf32, #tpu.memory_space<vmem>>, %arg3: memref<56x1xf32, #tpu.memory_space<vmem>>, %arg4: memref<56x128xf32, #tpu.memory_space<vmem>>) attributes {dimension_semantics = [#tpu.dimension_semantics<parallel>], iteration_bounds = array<i64: 1>, scalar_prefetch = 0 : i64, scratch_operands = 0 : i64, tpu.core_type = #tpu.core_type<tc>, window_params = [{transform_indices = @transform_0, window_bounds = array<i64: 3, 128>}, {pipeline_mode = #tpu.pipeline_mode<synchronous>, transform_indices = @transform_1, window_bounds = array<i64: 56, 3>}, {pipeline_mode = #tpu.pipeline_mode<synchronous>, transform_indices = @transform_2, window_bounds = array<i64: 56, 1>}, {transform_indices = @transform_3, window_bounds = array<i64: 56, 128>}]} {
    %c0 = arith.constant 0 : index
    %c0_0 = arith.constant 0 : index
    %0 = vector.load %arg1[%c0, %c0_0] : memref<3x128xf32, #tpu.memory_space<vmem>>, vector<3x128xf32>
    %c0_1 = arith.constant 0 : index
    %c0_2 = arith.constant 0 : index
    %1 = vector.load %arg2[%c0_1, %c0_2] : memref<56x3xf32, #tpu.memory_space<vmem>>, vector<56x3xf32>
    %2 = vector.extract_strided_slice %1 {offsets = [0, 0], sizes = [56, 1], strides = [1, 1]} : vector<56x3xf32> to vector<56x1xf32>
    %3 = vector.extract_strided_slice %0 {offsets = [0, 0], sizes = [1, 128], strides = [1, 1]} : vector<3x128xf32> to vector<1x128xf32>
    %4 = vector.broadcast %2 : vector<56x1xf32> to vector<56x128xf32>
    %5 = vector.broadcast %3 : vector<1x128xf32> to vector<56x128xf32>
    %6 = arith.mulf %4, %5 : vector<56x128xf32>
    %7 = vector.extract_strided_slice %1 {offsets = [0, 1], sizes = [56, 1], strides = [1, 1]} : vector<56x3xf32> to vector<56x1xf32>
    %8 = vector.extract_strided_slice %0 {offsets = [1, 0], sizes = [1, 128], strides = [1, 1]} : vector<3x128xf32> to vector<1x128xf32>
    %9 = vector.broadcast %7 : vector<56x1xf32> to vector<56x128xf32>
    %10 = vector.broadcast %8 : vector<1x128xf32> to vector<56x128xf32>
    %11 = arith.mulf %9, %10 : vector<56x128xf32>
    %12 = arith.addf %6, %11 : vector<56x128xf32>
    %13 = vector.extract_strided_slice %1 {offsets = [0, 2], sizes = [56, 1], strides = [1, 1]} : vector<56x3xf32> to vector<56x1xf32>
    %14 = vector.extract_strided_slice %0 {offsets = [2, 0], sizes = [1, 128], strides = [1, 1]} : vector<3x128xf32> to vector<1x128xf32>
    %15 = vector.broadcast %13 : vector<56x1xf32> to vector<56x128xf32>
    %16 = vector.broadcast %14 : vector<1x128xf32> to vector<56x128xf32>
    %17 = arith.mulf %15, %16 : vector<56x128xf32>
    %18 = arith.addf %12, %17 : vector<56x128xf32>
    %c0_3 = arith.constant 0 : index
    %c0_4 = arith.constant 0 : index
    %19 = vector.load %arg3[%c0_3, %c0_4] : memref<56x1xf32, #tpu.memory_space<vmem>>, vector<56x1xf32>
    %20 = vector.broadcast %19 : vector<56x1xf32> to vector<56x128xf32>
    %21 = arith.addf %18, %20 : vector<56x128xf32>
    %c0_5 = arith.constant 0 : index
    %c0_6 = arith.constant 0 : index
    %22 = vector.load %arg4[%c0_5, %c0_6] : memref<56x128xf32, #tpu.memory_space<vmem>>, vector<56x128xf32>
    tpu.vector_store %arg4[%c0_5, %c0_6], %21 {strides = array<i32>} : memref<56x128xf32, #tpu.memory_space<vmem>>, vector<56x128xf32>,
    return
  }
  func.func @transform_0(%arg0: i32) -> (i32, i32) {
    %c0_i32 = arith.constant 0 : i32
    %c0_i32_0 = arith.constant 0 : i32
    return %c0_i32, %arg0 : i32, i32
  }
  func.func @transform_1(%arg0: i32) -> (i32, i32) {
    %c0_i32 = arith.constant 0 : i32
    %c0_i32_0 = arith.constant 0 : i32
    %c0_i32_1 = arith.constant 0 : i32
    return %c0_i32, %c0_i32_0 : i32, i32
  }
  func.func @transform_2(%arg0: i32) -> (i32, i32) {
    %c0_i32 = arith.constant 0 : i32
    %c0_i32_0 = arith.constant 0 : i32
    %c0_i32_1 = arith.constant 0 : i32
    return %c0_i32, %c0_i32_0 : i32, i32
  }
  func.func @transform_3(%arg0: i32) -> (i32, i32) {
    %c0_i32 = arith.constant 0 : i32
    %c0_i32_0 = arith.constant 0 : i32
    return %c0_i32, %arg0 : i32, i32
  }
}

</mosaic_0001>

<bundles_post_ra>
// kernel: tpu_custom_call.1
= control target key start
LH: loop header
LB: loop body
LE: loop exit
PB: predicated region body
PF: predicated region fallthrough
CT: control target
= control target key end

     0   :  { %v269_v2 = vmov 1   ;;  %v270_v3 = vmov 0   ;;  %s346_s0 = inlined_call_operand.vmem [shape: f32[3,128], index: 0, kind: input, shape index: {}]   ;;  %s347_s1 = inlined_call_operand.vmem [shape: f32[56,3], index: 1, kind: input, shape index: {}]   ;;  %s348_s2 = inlined_call_operand.vmem [shape: f32[56,1], index: 2, kind: input, shape index: {}]   ;;  %s349_s3 = inlined_call_operand.hbm [shape: f32[56,128], index: 3, kind: output, shape index: {}]  }
   0x1   :  { %v20_v0 = vld [vmem:[%s347_s1 + $0x20] sm:$0xff]  ;;  %v18_v1 = vld [vmem:[%s347_s1 + $0x10] sm:$0xff]  ;;  %236 = vset.pattern.permute.xlu0 %v269_v2  ;;  %233 = vset.pattern.permute.xlu2 %v270_v3 }
   0x2   :  { %232 = vset.pattern.permute.xlu1 %v270_v3  ;;  %45 = vperm.xlu2 %233, %v20_v0  }
   0x3   :  { %8 = vsyncpa [#allocation3], 0  ;;  %75 = vperm.xlu0 %236, %v18_v1   ;;  %35 = vperm.xlu1 %232, %v18_v1   ;;  %v21_v4 = vld [vmem:[%s347_s1 + $0x28] sm:$0xff]  ;;  %v19_v5 = vld [vmem:[%s347_s1 + $0x18] sm:$0xff]  ;;  %v271_v7 = vmov 2   ;;  %s214_s16 = sshll.u32 %s349_s3, 4  ;;  %s215_s16 = int_to_ptr.hbm [resolvable:$true] %s214_s16 }
   0x4   :  { %v16_v6 = vld [vmem:[%s347_s1] sm:$0xff]  ;;  %v17_v8 = vld [vmem:[%s347_s1 + $0x8] sm:$0xff]  ;;  %v22_v9 = vld [vmem:[%s347_s1 + $0x30] sm:$0xff]  ;;  %s273_s17 = smov 128   ;;  %s274_s18 = smov 8  }
   0x5   :  { %v153_v10 = vld [vmem:[%s348_s2 + $0x8] sm:$0xff]  ;;  %v158_v11 = vld [vmem:[%s348_s2 + $0x30] sm:$0xff]  ;;  %v152_v12 = vld [vmem:[%s348_s2] sm:$0xff] }
   0x6   :  { %v155_v13 = vld [vmem:[%s348_s2 + $0x18] sm:$0xff]  ;;  %v154_v14 = vld [vmem:[%s348_s2 + $0x10] sm:$0xff]  ;;  %v157_v15 = vld [vmem:[%s348_s2 + $0x28] sm:$0xff] }
   0x7   :  { %v156_v16 = vld [vmem:[%s348_s2 + $0x20] sm:$0xff] }
   0x8   :  { %v15_v20 = vld [vmem:[%s346_s0] sm:$0x7]  ;;  %s272_s0 = smov [#allocation2]  }
   0x9   :  { %v58_v21 = vperm.slane %v15_v20, 0  ;;  %v94_v22 = vperm.slane %v15_v20, 1  ;;  %v137_v40 = vperm.slane %v15_v20, 2  ;;  %s212_s2 = sshll.u32 %s272_s0, 4  ;;  %s213_s2 = int_to_ptr.vmem [resolvable:$true] %s212_s2 }
   0xa   :  { %50 = vperm.xlu2 %233, %v21_v4  }
   0xb   :  { %237 = vset.pattern.permute.xlu0 %v271_v7  ;;  %40 = vperm.xlu1 %232, %v19_v5  }
   0xc   :  { %110 = vperm.xlu0 %237, %v16_v6  }
  0x12   :  { %235 = vset.pattern.permute.xlu2 %v269_v2 }
  0x13   :  { %234 = vset.pattern.permute.xlu1 %v269_v2  ;;  %71 = vperm.xlu2 %235, %v17_v8  }
  0x14   :  { %130 = vperm.xlu0 %237, %v21_v4   ;;  %67 = vperm.xlu1 %234, %v16_v6  }
  0x1b   :  { %83 = vperm.xlu2 %235, %v20_v0  }
  0x1c   :  { %240 = vset.pattern.permute.xlu0 %v270_v3  ;;  %79 = vperm.xlu1 %234, %v19_v5  }
  0x1d   :  { %25 = vperm.xlu0 %240, %v16_v6  }
  0x23   :  { %91 = vperm.xlu2 %235, %v22_v9  }
  0x24   :  { %87 = vperm.xlu1 %234, %v21_v4  }
  0x25   :  { %30 = vperm.xlu0 %240, %v17_v8  }
  0x2b   :  { %239 = vset.pattern.permute.xlu2 %v271_v7 }
  0x2c   :  { %238 = vset.pattern.permute.xlu1 %v271_v7  ;;  %118 = vperm.xlu2 %239, %v18_v1  }
  0x2d   :  { %55 = vperm.xlu0 %240, %v22_v9   ;;  %114 = vperm.xlu1 %238, %v17_v8  }
  0x34   :  { %126 = vperm.xlu2 %239, %v20_v0  }
  0x35   :  { %166 = vperm.xlu0 %240, %v153_v10   ;;  %122 = vperm.xlu1 %238, %v19_v5  }
  0x3c   :  { %241 = vset.pattern.permute.xlu2 %v270_v3 }
  0x3d   :  { %191 = vperm.xlu0 %240, %v158_v11   ;;  %134 = vperm.xlu1 %238, %v22_v9  }
  0x3e   :  { %161 = vperm.xlu2 %241, %v152_v12  }
  0x45   :  { %242 = vset.pattern.permute.xlu1 %v270_v3 }
  0x46   :  { %176 = vperm.xlu2 %241, %v155_v13   ;;  %171 = vperm.xlu1 %242, %v154_v14  }
  0x4e   :  { %186 = vperm.xlu2 %241, %v157_v15   ;;  %181 = vperm.xlu1 %242, %v156_v16  }
  0x5c   :  { %v46_v17 = vpop.permute.xlu2 %45 }
  0x5d   :  { %v63_v23 = vmul.f32 %v58_v21, %v46_v17 }
  0x64   :  { %v51_v18 = vpop.permute.xlu2 %50 }
  0x65   :  { %v64_v53 = vmul.f32 %v58_v21, %v51_v18 }
  0x6d   :  { %v72_v19 = vpop.permute.xlu2 %71 }
  0x6e   :  { %v96_v54 = vmul.f32 %v94_v22, %v72_v19 }
  0x75   :  { %v36_v24 = vpop.permute.xlu1 %35  ;;  %v76_v25 = vpop.permute.xlu0 %75 }
  0x76   :  { %v84_v26 = vpop.permute.xlu2 %83  ;;  %v97_v13 = vmul.f32 %v94_v22, %v76_v25  ;;  %v61_v14 = vmul.f32 %v58_v21, %v36_v24 }
  0x77   :  { %v99_v27 = vmul.f32 %v94_v22, %v84_v26 }
  0x78   :  { %v104_v19 = vadd.f32 %v97_v13, %v61_v14 }
  0x79   :  { %v340_v28 = vadd.f32 %v99_v27, %v63_v23 }
  0x7d   :  { %v41_v29 = vpop.permute.xlu1 %40 }
  0x7e   :  { %v92_v30 = vpop.permute.xlu2 %91  ;;  %v111_v31 = vpop.permute.xlu0 %110  ;;  %v62_v60 = vmul.f32 %v58_v21, %v41_v29 }
  0x7f   :  { %v138_v42 = vmul.f32 %v137_v40, %v111_v31  ;;  %v101_v9 = vmul.f32 %v94_v22, %v92_v30 }
  0x86   :  { %v68_v32 = vpop.permute.xlu1 %67  ;;  %v119_v33 = vpop.permute.xlu2 %118 }
  0x87   :  { %v131_v34 = vpop.permute.xlu0 %130  ;;  %v95_v39 = vmul.f32 %v94_v22, %v68_v32  ;;  %v140_v16 = vmul.f32 %v137_v40, %v119_v33 }
  0x88   :  { %v143_v59 = vmul.f32 %v137_v40, %v131_v34 }
  0x89   :  { %v147_v20 = vadd.f32 %v140_v16, %v104_v19 }
  0x8e   :  { %v80_v35 = vpop.permute.xlu1 %79  ;;  %v127_v36 = vpop.permute.xlu2 %126 }
  0x8f   :  { %v26_v37 = vpop.permute.xlu0 %25  ;;  %v98_v57 = vmul.f32 %v94_v22, %v80_v35  ;;  %v142_v27 = vmul.f32 %v137_v40, %v127_v36 }
  0x90   :  { %v59_v38 = vmul.f32 %v58_v21, %v26_v37 }
  0x91   :  { %v105_v1 = vadd.f32 %v98_v57, %v62_v60 }
  0x92   :  { %v102_v41 = vadd.f32 %v95_v39, %v59_v38 }
  0x94   :  { %v145_v45 = vadd.f32 %v138_v42, %v102_v41 }
  0x96   :  { %v88_v43 = vpop.permute.xlu1 %87 }
  0x97   :  { %v31_v44 = vpop.permute.xlu0 %30  ;;  %v100_v48 = vmul.f32 %v94_v22, %v88_v43  ;;  %v149_v22 = vadd.f32 %v142_v27, %v340_v28 }
  0x98   :  { %v162_v46 = vpop.permute.xlu2 %161  ;;  %v60_v51 = vmul.f32 %v58_v21, %v31_v44 }
  0x99   :  { %v194_v47 = vadd.f32 %v162_v46, %v145_v45  ;;  %v107_v56 = vadd.f32 %v100_v48, %v64_v53 }
  0x9a   :  { %v103_v58 = vadd.f32 %v96_v54, %v60_v51 }
  0x9b   :  { %201 = vst [vmem:[#allocation2] sm:$0xff] %v194_v47  ;;  %v150_v0 = vadd.f32 %v143_v59, %v107_v56 }
  0x9f   :  { %v56_v49 = vpop.permute.xlu0 %55  ;;  %v115_v50 = vpop.permute.xlu1 %114 }
  0xa0   :  { %v177_v52 = vpop.permute.xlu2 %176  ;;  %v139_v55 = vmul.f32 %v137_v40, %v115_v50  ;;  %v65_v7 = vmul.f32 %v58_v21, %v56_v49 }
  0xa2   :  { %v146_v61 = vadd.f32 %v139_v55, %v103_v58  ;;  %v108_v11 = vadd.f32 %v101_v9, %v65_v7 }
  0xa7   :  { %v167_v62 = vpop.permute.xlu0 %166  ;;  %v123_v63 = vpop.permute.xlu1 %122 }
  0xa8   :  { %v195_v2 = vadd.f32 %v167_v62, %v146_v61  ;;  %v141_v3 = vmul.f32 %v137_v40, %v123_v63  ;;  %v187_v4 = vpop.permute.xlu2 %186 }
  0xa9   :  { %v199_v5 = vadd.f32 %v187_v4, %v150_v0 }
  0xaa   :  { %202 = vst [vmem:[#allocation2 + $0x8] sm:$0xff] %v195_v2  ;;  %v148_v6 = vadd.f32 %v141_v3, %v105_v1 }
  0xab   :  { %206 = vst [vmem:[#allocation2 + $0x28] sm:$0xff] %v199_v5 }
  0xac   :  { %v197_v8 = vadd.f32 %v177_v52, %v148_v6 }
  0xae   :  { %204 = vst [vmem:[#allocation2 + $0x18] sm:$0xff] %v197_v8 }
  0xaf   :  { %v135_v10 = vpop.permute.xlu1 %134  ;;  %v192_v17 = vpop.permute.xlu0 %191 }
  0xb0   :  { %v144_v12 = vmul.f32 %v137_v40, %v135_v10 }
  0xb2   :  { %v151_v15 = vadd.f32 %v144_v12, %v108_v11 }
  0xb4   :  { %v200_v18 = vadd.f32 %v192_v17, %v151_v15 }
  0xb6   :  { %207 = vst [vmem:[#allocation2 + $0x30] sm:$0xff] %v200_v18 }
  0xb8   :  { %v172_v23 = vpop.permute.xlu1 %171 }
  0xb9   :  { %v196_v26 = vadd.f32 %v172_v23, %v147_v20 }
  0xbb   :  { %203 = vst [vmem:[#allocation2 + $0x10] sm:$0xff] %v196_v26 }
  0xc0   :  { %v182_v21 = vpop.permute.xlu1 %181 }
  0xc1   :  { %v198_v24 = vadd.f32 %v182_v21, %v149_v22 }
  0xc3   :  { %205 = vst [vmem:[#allocation2 + $0x20] sm:$0xff] %v198_v24 }
  0xc4   :  { %220 = dma.vmem_to_hbm [thread:$0]  %s213_s2, 896, %s215_s16, [#allocation3], %s273_s17, %s273_s17, %s274_s18  }
  0xc5   :  { %267 = dma.done.wait [#allocation3], 896  }
  0xc6   :  { %268 = vsyncadd [#allocation3], 4294966400 }
  0xc7   :  { %225 = vsyncpa [#allocation3], 1 }

</bundles_post_ra>
